<compile_context>
chip_gen: v7x
topology: tpu7x:2x2x1
jax: 0.10.0
libtpu: 0.0.40
codegen_flags: <defaults>
</compile_context>

<pallas_src>
import functools

import jax
import jax.numpy as jnp
from jax import lax
from jax.experimental import pallas as pl
from jax.experimental.pallas import tpu as pltpu

_HALO = 8  # halo blocks are fetched as 8-row blocks (minimum sublane tile)


def _hetconv_kernel(body_ref, top_ref, bot_ref, w_ref, b_ref, o_ref):
    """One (batch, H-strip) tile per grid step; everything lane-dense.

    body_ref : (1, TH, W*Cin)    strip rows [i*TH, (i+1)*TH), width packed on lanes
    top_ref  : (1, 8,  W*Cin)    8-row block containing global row i*TH - 1 (clamped)
    bot_ref  : (1, 8,  W*Cin)    8-row block containing global row (i+1)*TH (clamped)
    w_ref    : (3*W*Cin, W*Cout) width-unrolled band weight (kx + width padding
                                 folded in; grouped 1x1 folded into centre tap)
    b_ref    : (1, W*Cout)       merged bias, tiled per output width block (f32)
    o_ref    : (1, TH, W*Cout)
    """
    i = pl.program_id(1)
    n_strips = pl.num_programs(1)
    TH = o_ref.shape[1]

    x = body_ref[0]                                        # (TH, W*Cin)

    # Height halo rows: last row of the strip above / first row of the strip
    # below; zeroed at the image borders.  Halo-only zeroing -- no scratch,
    # no full-slab zero fill.
    top = top_ref[0, _HALO - 1:_HALO, :]                   # (1, W*Cin)
    bot = bot_ref[0, 0:1, :]                               # (1, W*Cin)
    top = jnp.where(i > 0, top, jnp.zeros_like(top))
    bot = jnp.where(i < n_strips - 1, bot, jnp.zeros_like(bot))

    # ky = 0 / 2 shifted views of the strip (output row h sees input rows h-1 / h+1).
    x_up = jnp.concatenate([top, x[:TH - 1, :]], axis=0)   # (TH, W*Cin)
    x_dn = jnp.concatenate([x[1:, :], bot], axis=0)        # (TH, W*Cin)

    # Single fused contraction: the three ky taps are stacked on the lane axis
    # (K = 3*W*Cin); the three kx taps live inside the banded weight.  The 9
    # small K=Cin matmuls of the naive kernel collapse into one MXU call with
    # a single f32 accumulator tile.
    lhs = jnp.concatenate([x_up, x, x_dn], axis=-1)        # (TH, 3*W*Cin)
    acc = jnp.dot(lhs, w_ref[...], preferred_element_type=jnp.float32)
    acc = acc + b_ref[...]                                 # (1, W*Cout) broadcast
    o_ref[0] = acc.astype(o_ref.dtype)                     # lane-dense, unmasked store


def _group_dense_weight(w, groups):
    """PyTorch grouped-conv weight (Cout, Cin/groups, kh, kw) -> dense
    block-diagonal (kh, kw, Cin, Cout).  Exact `groups=` semantics (entries
    outside each group's block are zero).  Fully vectorised."""
    cout, cin_g, kh, kw = w.shape
    cin = cin_g * groups
    cout_g = cout // groups
    ci = jnp.arange(cin)
    co = jnp.arange(cout)
    same_group = (ci[:, None] // cin_g) == (co[None, :] // cout_g)     # (Cin, Cout)
    gathered = w[co[None, :], ci[:, None] % cin_g, :, :]               # (Cin, Cout, kh, kw)
    dense = jnp.where(same_group[:, :, None, None], gathered, 0.0)
    return jnp.transpose(dense, (2, 3, 0, 1)).astype(w.dtype)          # (kh, kw, Cin, Cout)


def _band_weight(w3, W, dtype):
    """Dense 3x3 weight (3, 3, Cin, Cout) -> width-unrolled band matrix
    (3*W*Cin, W*Cout).

    band[ky*W*Cin + wi*Cin + ci, wo*Cout + co] = w3[ky, wi - wo + 1, ci, co]
    when |wi - wo| <= 1 and zero otherwise, so the kx shifts AND the width
    zero-padding are absorbed into the weight; the kernel's input/output stay
    packed with (W, C) on the lane axis and need no width halo handling."""
    kx = jnp.arange(W)[:, None] - jnp.arange(W)[None, :] + 1            # (Wi, Wo)
    valid = (kx >= 0) & (kx <= 2)
    band = w3[:, jnp.clip(kx, 0, 2)]                                    # (3, Wi, Wo, Cin, Cout)
    band = jnp.where(valid[None, :, :, None, None], band, 0.0)
    band = jnp.transpose(band, (0, 1, 3, 2, 4))                         # (3, Wi, Cin, Wo, Cout)
    cin, cout = w3.shape[2], w3.shape[3]
    return band.reshape(3 * W * cin, W * cout).astype(dtype)


def hetconv_pallas_nhwc(x_nhwc, gw_weight, gw_bias, pw_weight, pw_bias,
                        *, g, p, compute_dtype=jnp.float32, out_dtype=None,
                        strip_h=8):
    """Fused HetConv on NHWC activations (TPU-native path).

    Returns NHWC output.  `compute_dtype=jnp.bfloat16` halves DMA/VMEM bytes
    on v6e/v7x (accumulation stays f32); `out_dtype=jnp.bfloat16` additionally
    halves the output HBM writes when the consumer allows it."""
    N, H, W, Cin = x_nhwc.shape
    Cout = gw_weight.shape[0]
    assert gw_weight.shape[2] == 3 and gw_weight.shape[3] == 3, "only k=3 supported"
    out_dtype = x_nhwc.dtype if out_dtype is None else out_dtype

    TH = min(strip_h, H)
    assert TH % 8 == 0 and H % TH == 0, "H must be a multiple of the (8-aligned) strip height"
    n_strips = H // TH
    thb = TH // _HALO          # strip height in 8-row blocks
    hb = H // _HALO            # image height in 8-row blocks
    WCin, WCout = W * Cin, W * Cout

    # Dense block-diagonal weights (exact grouped-conv semantics); fold the
    # grouped 1x1 pointwise conv into the 3x3 centre tap, merge the biases,
    # then unroll the width/kx structure into the band matrix.
    w3 = _group_dense_weight(gw_weight, g)                 # (3, 3, Cin, Cout)
    w1 = _group_dense_weight(pw_weight, p)[0, 0]           # (Cin, Cout)
    w3 = w3.at[1, 1].add(w1)
    w_big = _band_weight(w3, W, compute_dtype)             # (3*W*Cin, W*Cout)
    bias = (gw_bias + pw_bias).astype(jnp.float32)
    bias_packed = jnp.tile(bias, (W,)).reshape(1, WCout)   # [wo*Cout + co] -> bias[co]

    # Lane-dense packed activation: (N, H, W*Cin); reshape of contiguous NHWC is free.
    x_p = x_nhwc.astype(compute_dtype).reshape(N, H, WCin)

    itemsize = jnp.dtype(compute_dtype).itemsize
    cost = pl.CostEstimate(
        flops=2 * N * H * W * 9 * Cin * Cout,
        transcendentals=0,
        bytes_accessed=(x_p.size * itemsize
                        + N * H * WCout * jnp.dtype(out_dtype).itemsize
                        + w_big.size * itemsize + bias_packed.size * 4),
    )

    out_packed = pl.pallas_call(
        _hetconv_kernel,
        out_shape=jax.ShapeDtypeStruct((N, H, WCout), out_dtype),
        grid_spec=pltpu.PrefetchScalarGridSpec(
            num_scalar_prefetch=0,
            grid=(N, n_strips),
            in_specs=[
                # body strip (H blocked in units of TH)
                pl.BlockSpec((1, TH, WCin), lambda b, i: (b, i, 0)),
                # top halo: 8-row block containing row i*TH - 1 (clamped at i=0)
                pl.BlockSpec((1, _HALO, WCin),
                             lambda b, i: (b, jnp.maximum(i * thb - 1, 0), 0)),
                # bottom halo: 8-row block containing row (i+1)*TH (clamped at last strip)
                pl.BlockSpec((1, _HALO, WCin),
                             lambda b, i: (b, jnp.minimum((i + 1) * thb, hb - 1), 0)),
                pl.BlockSpec((3 * WCin, WCout), lambda b, i: (0, 0)),
                pl.BlockSpec((1, WCout), lambda b, i: (0, 0)),
            ],
            out_specs=pl.BlockSpec((1, TH, WCout), lambda b, i: (b, i, 0)),
        ),
        compiler_params=pltpu.CompilerParams(
            # Both axes independent -> shard over TensorCores (v7x megacore).
            dimension_semantics=("parallel", "parallel"),
            # Conservative everywhere (<= v7x's 64 MiB physical VMEM); raise
            # toward ~100 MiB on v5e/v6e when using much larger strips.
            vmem_limit_bytes=32 * 1024 * 1024,
        ),
        cost_estimate=cost,
    )(x_p, x_p, x_p, w_big, bias_packed)

    return out_packed.reshape(N, H, W, Cout)


def hetconv_pallas(x_nchw, gw_weight, gw_bias, pw_weight, pw_bias,
                   *, g, p, compute_dtype=jnp.float32, out_dtype=None, strip_h=8):
    """PyTorch-interface HetConv: NCHW in, NCHW out (== gwc(x) + pwc(x)).
    The two boundary transposes are the only wrapper-side HBM passes; callers
    that keep activations NHWC should use hetconv_pallas_nhwc directly."""
    x_nhwc = jnp.transpose(x_nchw, (0, 2, 3, 1))
    out = hetconv_pallas_nhwc(x_nhwc, gw_weight, gw_bias, pw_weight, pw_bias,
                              g=g, p=p, compute_dtype=compute_dtype,
                              out_dtype=out_dtype, strip_h=strip_h)
    return jnp.transpose(out, (0, 3, 1, 2))


def _reference(x_nchw, gw_weight, gw_bias, pw_weight, pw_bias, g, p):
    """Pure-JAX reference using lax.conv_general_dilated (grouped convs)."""
    dn = ("NCHW", "OIHW", "NCHW")
    gwc = lax.conv_general_dilated(
        x_nchw, gw_weight, window_strides=(1, 1), padding=[(1, 1), (1, 1)],
        dimension_numbers=dn, feature_group_count=g)
    gwc = gwc + gw_bias.reshape(1, -1, 1, 1)
    pwc = lax.conv_general_dilated(
        x_nchw, pw_weight, window_strides=(1, 1), padding="VALID",
        dimension_numbers=dn, feature_group_count=p)
    pwc = pwc + pw_bias.reshape(1, -1, 1, 1)
    return gwc + pwc


if __name__ == "__main__":
    # Small deterministic setup consistent with the module:
    # Conv2d(Cin, Cout, k=3, groups=g, padding=1) + Conv2d(Cin, Cout, k=1, groups=p)
    N, Cin, Cout, H, W = 2, 8, 8, 16, 16
    g, p = 4, 2

    key = jax.random.PRNGKey(0)
    k_x, k_w3, k_b3, k_w1, k_b1 = jax.random.split(key, 5)

    x = jax.random.normal(k_x, (N, Cin, H, W), jnp.float32)
    # PyTorch grouped-conv weight shapes: (Cout, Cin/groups, kh, kw); bias (Cout,)
    gw_weight = jax.random.normal(k_w3, (Cout, Cin // g, 3, 3), jnp.float32) * 0.1
    gw_bias = jax.random.normal(k_b3, (Cout,), jnp.float32) * 0.1
    pw_weight = jax.random.normal(k_w1, (Cout, Cin // p, 1, 1), jnp.float32) * 0.1
    pw_bias = jax.random.normal(k_b1, (Cout,), jnp.float32) * 0.1

    ref = _reference(x, gw_weight, gw_bias, pw_weight, pw_bias, g, p)

    # f32 compute path (tight check vs reference).
    run_f32 = jax.jit(functools.partial(hetconv_pallas, g=g, p=p))
    out = jax.block_until_ready(run_f32(x, gw_weight, gw_bias, pw_weight, pw_bias))
    assert out.shape == (N, Cout, H, W)
    assert jnp.allclose(out, ref, atol=1e-4, rtol=1e-4), "f32 mismatch vs reference"

    # bf16 compute path (v6e/v7x-friendly: half the DMA/VMEM traffic, f32 accum).
    run_bf16 = jax.jit(functools.partial(hetconv_pallas, g=g, p=p,
                                         compute_dtype=jnp.bfloat16))
    out_bf16 = jax.block_until_ready(
        run_bf16(x, gw_weight, gw_bias, pw_weight, pw_bias))
    assert jnp.allclose(out_bf16, ref, atol=5e-2, rtol=5e-2), "bf16 mismatch vs reference"

    print("KERNEL_OK")
</pallas_src>

<mosaic_0001>
module attributes {stable_mosaic.version = 11 : i64} {
  func.func @_hetconv_kernel(%arg0: i32, %arg1: i32, %arg2: memref<1x8x128xf32, #tpu.memory_space<vmem>>, %arg3: memref<1x8x128xf32, #tpu.memory_space<vmem>>, %arg4: memref<1x8x128xf32, #tpu.memory_space<vmem>>, %arg5: memref<384x128xf32, #tpu.memory_space<vmem>>, %arg6: memref<1x128xf32, #tpu.memory_space<vmem>>, %arg7: memref<1x8x128xf32, #tpu.memory_space<vmem>>) attributes {dimension_semantics = [#tpu.dimension_semantics<parallel>, #tpu.dimension_semantics<parallel>], iteration_bounds = array<i64: 2, 2>, scalar_prefetch = 0 : i64, scratch_operands = 0 : i64, tpu.core_type = #tpu.core_type<tc>, window_params = [{transform_indices = @transform_0, window_bounds = array<i64: 1, 8, 128>}, {transform_indices = @transform_1, window_bounds = array<i64: 1, 8, 128>}, {transform_indices = @transform_2, window_bounds = array<i64: 1, 8, 128>}, {pipeline_mode = #tpu.pipeline_mode<synchronous>, transform_indices = @transform_3, window_bounds = array<i64: 384, 128>}, {pipeline_mode = #tpu.pipeline_mode<synchronous>, transform_indices = @transform_4, window_bounds = array<i64: 1, 128>}, {transform_indices = @transform_5, window_bounds = array<i64: 1, 8, 128>}]} {
    %c0 = arith.constant 0 : index
    %c0_0 = arith.constant 0 : index
    %c0_1 = arith.constant 0 : index
    %0 = vector.load %arg2[%c0, %c0_0, %c0_1] : memref<1x8x128xf32, #tpu.memory_space<vmem>>, vector<1x8x128xf32>
    %1 = vector.shape_cast %0 : vector<1x8x128xf32> to vector<8x128xf32>
    %c0_2 = arith.constant 0 : index
    %c7 = arith.constant 7 : index
    %c0_3 = arith.constant 0 : index
    %2 = vector.load %arg3[%c0_2, %c7, %c0_3] : memref<1x8x128xf32, #tpu.memory_space<vmem>>, vector<1x1x128xf32>
    %3 = vector.shape_cast %2 : vector<1x1x128xf32> to vector<1x128xf32>
    %c0_4 = arith.constant 0 : index
    %c0_5 = arith.constant 0 : index
    %c0_6 = arith.constant 0 : index
    %4 = vector.load %arg4[%c0_4, %c0_5, %c0_6] : memref<1x8x128xf32, #tpu.memory_space<vmem>>, vector<1x1x128xf32>
    %5 = vector.shape_cast %4 : vector<1x1x128xf32> to vector<1x128xf32>
    %c0_i32 = arith.constant 0 : i32
    %6 = arith.cmpi sgt, %arg1, %c0_i32 : i32
    %cst = arith.constant 0.000000e+00 : f32
    %7 = vector.broadcast %cst : f32 to vector<1x128xf32>
    %8 = arith.select %6, %3, %7 : vector<1x128xf32>
    %c1_i32 = arith.constant 1 : i32
    %9 = arith.cmpi slt, %arg1, %c1_i32 : i32
    %cst_7 = arith.constant 0.000000e+00 : f32
    %10 = vector.broadcast %cst_7 : f32 to vector<1x128xf32>
    %11 = arith.select %9, %5, %10 : vector<1x128xf32>
    %12 = vector.extract_strided_slice %1 {offsets = [0, 0], sizes = [7, 128], strides = [1, 1]} : vector<8x128xf32> to vector<7x128xf32>
    %13 = tpu.concatenate %8, %12 in 0 : vector<1x128xf32>, vector<7x128xf32> -> vector<8x128xf32>
    %14 = vector.extract_strided_slice %1 {offsets = [1, 0], sizes = [7, 128], strides = [1, 1]} : vector<8x128xf32> to vector<7x128xf32>
    %15 = tpu.concatenate %14, %11 in 0 : vector<7x128xf32>, vector<1x128xf32> -> vector<8x128xf32>
    %16 = tpu.concatenate %13, %1, %15 in 1 : vector<8x128xf32>, vector<8x128xf32>, vector<8x128xf32> -> vector<8x384xf32>
    %c0_8 = arith.constant 0 : index
    %c0_9 = arith.constant 0 : index
    %17 = vector.load %arg5[%c0_8, %c0_9] : memref<384x128xf32, #tpu.memory_space<vmem>>, vector<384x128xf32>
    %cst_10 = arith.constant dense<0.000000e+00> : vector<8x128xf32>
    %18 = tpu.matmul %16, %17, %cst_10 {dimension_numbers = #tpu.dot_dimension_numbers<[1], [0], [0], [1], [0, 0, 1, 1], [], []>} : vector<8x384xf32>, vector<384x128xf32>, vector<8x128xf32> -> vector<8x128xf32>
    %c0_11 = arith.constant 0 : index
    %c0_12 = arith.constant 0 : index
    %19 = vector.load %arg6[%c0_11, %c0_12] : memref<1x128xf32, #tpu.memory_space<vmem>>, vector<1x128xf32>
    %20 = vector.broadcast %19 : vector<1x128xf32> to vector<8x128xf32>
    %21 = arith.addf %18, %20 : vector<8x128xf32>
    %c0_13 = arith.constant 0 : index
    %c0_14 = arith.constant 0 : index
    %c0_15 = arith.constant 0 : index
    %22 = vector.load %arg7[%c0_13, %c0_14, %c0_15] : memref<1x8x128xf32, #tpu.memory_space<vmem>>, vector<1x8x128xf32>
    %23 = vector.shape_cast %22 : vector<1x8x128xf32> to vector<8x128xf32>
    %24 = vector.shape_cast %21 : vector<8x128xf32> to vector<1x8x128xf32>
    tpu.vector_store %arg7[%c0_13, %c0_14, %c0_15], %24 {strides = array<i32>} : memref<1x8x128xf32, #tpu.memory_space<vmem>>, vector<1x8x128xf32>,
    return
  }
  func.func @transform_0(%arg0: i32, %arg1: i32) -> (i32, i32, i32) {
    %c0_i32 = arith.constant 0 : i32
    %c0_i32_0 = arith.constant 0 : i32
    return %arg0, %arg1, %c0_i32 : i32, i32, i32
  }
  func.func @transform_1(%arg0: i32, %arg1: i32) -> (i32, i32, i32) {
    %c1_i32 = arith.constant 1 : i32
    %0 = arith.muli %arg1, %c1_i32 : i32
    %c1_i32_0 = arith.constant 1 : i32
    %1 = arith.subi %0, %c1_i32_0 : i32
    %c0_i32 = arith.constant 0 : i32
    %2 = arith.maxsi %1, %c0_i32 : i32
    %c0_i32_1 = arith.constant 0 : i32
    %c0_i32_2 = arith.constant 0 : i32
    return %arg0, %2, %c0_i32_1 : i32, i32, i32
  }
  func.func @transform_2(%arg0: i32, %arg1: i32) -> (i32, i32, i32) {
    %c1_i32 = arith.constant 1 : i32
    %0 = arith.addi %arg1, %c1_i32 : i32
    %c1_i32_0 = arith.constant 1 : i32
    %1 = arith.muli %0, %c1_i32_0 : i32
    %c1_i32_1 = arith.constant 1 : i32
    %2 = arith.minsi %1, %c1_i32_1 : i32
    %c0_i32 = arith.constant 0 : i32
    %c0_i32_2 = arith.constant 0 : i32
    return %arg0, %2, %c0_i32 : i32, i32, i32
  }
  func.func @transform_3(%arg0: i32, %arg1: i32) -> (i32, i32) {
    %c0_i32 = arith.constant 0 : i32
    %c0_i32_0 = arith.constant 0 : i32
    %c0_i32_1 = arith.constant 0 : i32
    return %c0_i32, %c0_i32_0 : i32, i32
  }
  func.func @transform_4(%arg0: i32, %arg1: i32) -> (i32, i32) {
    %c0_i32 = arith.constant 0 : i32
    %c0_i32_0 = arith.constant 0 : i32
    %c0_i32_1 = arith.constant 0 : i32
    return %c0_i32, %c0_i32_0 : i32, i32
  }
  func.func @transform_5(%arg0: i32, %arg1: i32) -> (i32, i32, i32) {
    %c0_i32 = arith.constant 0 : i32
    %c0_i32_0 = arith.constant 0 : i32
    return %arg0, %arg1, %c0_i32 : i32, i32, i32
  }
}

</mosaic_0001>

<bundles_post_ra>
// kernel: tile.8
= control target key start
LH: loop header
LB: loop body
LE: loop exit
PB: predicated region body
PF: predicated region fallthrough
CT: control target
= control target key end

     0   :  { %s28_s0 = inlined_call_operand.vmem [shape: f32[8], index: 0, kind: input, shape index: {}]   ;;  %s29_s1 = inlined_call_operand.vmem [shape: f32[16,8], index: 1, kind: output, shape index: {}]  }
   0x1   :  { %v4_v0 = vld [vmem:[%s28_s0] ss:$0 sm:$0xff] }
   0x2   :  { %5 = vst [vmem:[%s29_s1] sm:$0xff] %v4_v0  ;;  %8 = vst [vmem:[%s29_s1 + $0x8] sm:$0xff] %v4_v0 }

// kernel: tile.9
= control target key start
LH: loop header
LB: loop body
LE: loop exit
PB: predicated region body
PF: predicated region fallthrough
CT: control target
= control target key end

     0   :  { %s131_s10 = smov 120   ;;  %s132_s11 = smov 104   ;;  %vm3_vm0 = vcmask 64512   ;;  %vm9_vm1 = vcmask 1048512   ;;  %vm15_vm2 = vcmask 982912   ;;  %vm21_vm3 = vcmask 917312   ;;  %s207_s0 = inlined_call_operand.vmem [shape: f32[16,8], index: 0, kind: input, shape index: {}]   ;;  %s208_s1 = inlined_call_operand.vmem [shape: f32[1,128], index: 1, kind: output, shape index: {}]  }
   0x1   :  { %v101_v0 = vld [vmem:[%s207_s0 + $0xf] sm:$0x1]   ;;  %v103_v1 = vld [vmem:[%s207_s0 + $0xd] sm:$0x1]   ;;  %v102_v2 = vld [vmem:[%s207_s0 + $0xe] sm:$0x1]  }
   0x2   :  { %7 = vrot.lane.b32.xlu0 %v101_v0, %s131_s10  ;;  %19 = vrot.lane.b32.xlu1 %v103_v1, %s132_s11  ;;  %v104_v3 = vld [vmem:[%s207_s0 + $0xc] sm:$0x1]   ;;  %s133_s16 = smov 112   ;;  %s134_s17 = smov 96   ;;  %v105_v4 = vld [vmem:[%s207_s0 + $0xb] sm:$0x1]  }
   0x3   :  { %v106_v5 = vld [vmem:[%s207_s0 + $0xa] sm:$0x1]   ;;  %v2_v6 = vld [vmem:[%s207_s0] sm:$0x1]   ;;  %s135_s24 = smov 88   ;;  %s136_s25 = smov 80  }
   0x4   :  { %4 = vst.msk [vmem:[#allocation0] sm:$0x1] %vm3_vm0, %v2_v6   ;;  %v107_v7 = vld [vmem:[%s207_s0 + $0x9] sm:$0x1]   ;;  %v108_v8 = vld [vmem:[%s207_s0 + $0x8] sm:$0x1]  }
   0x5   :  { %s137_s30 = smov 72   ;;  %s138_s2 = smov 64   ;;  %v109_v9 = vld [vmem:[%s207_s0 + $0x7] sm:$0x1]   ;;  %v110_v10 = vld [vmem:[%s207_s0 + $0x6] sm:$0x1]  }
   0x6   :  { %13 = vrot.lane.b32.xlu0 %v102_v2, %s133_s16  ;;  %25 = vrot.lane.b32.xlu1 %v104_v3, %s134_s17  ;;  %s139_s7 = smov 56   ;;  %s140_s8 = smov 48   ;;  %v111_v11 = vld [vmem:[%s207_s0 + $0x5] sm:$0x1]   ;;  %v112_v12 = vld [vmem:[%s207_s0 + $0x4] sm:$0x1]  }
   0x7   :  { %s141_s13 = smov 40   ;;  %s142_s14 = smov 32   ;;  %v113_v13 = vld [vmem:[%s207_s0 + $0x3] sm:$0x1]   ;;  %v114_v14 = vld [vmem:[%s207_s0 + $0x2] sm:$0x1]  }
   0x8   :  { %s143_s19 = smov 24   ;;  %s144_s20 = smov 16   ;;  %v115_v15 = vld [vmem:[%s207_s0 + $0x1] sm:$0x1]   ;;  %vm27_vm4 = vcmask 851712   ;;  %vm33_vm5 = vcmask 786112  }
   0x9   :  { %s145_s0 = smov 8   ;;  %vm39_vm6 = vcmask 720512   ;;  %vm45_vm7 = vcmask 654912   ;;  %vm51_vm8 = vcmask 589312   ;;  %vm57_vm9 = vcmask 523712  }
   0xa   :  { %31 = vrot.lane.b32.xlu0 %v105_v4, %s135_s24  ;;  %37 = vrot.lane.b32.xlu1 %v106_v5, %s136_s25  ;;  %vm63_vm10 = vcmask 458112   ;;  %vm69_vm11 = vcmask 392512   ;;  %vm75_vm12 = vcmask 326912   ;;  %vm81_vm13 = vcmask 261312  }
   0xb   :  { %vm87_vm14 = vcmask 195712   ;;  %vm93_vm15 = vcmask 130112  }
   0xe   :  { %43 = vrot.lane.b32.xlu0 %v107_v7, %s137_s30  ;;  %49 = vrot.lane.b32.xlu1 %v108_v8, %s138_s2 }
  0x12   :  { %55 = vrot.lane.b32.xlu0 %v109_v9, %s139_s7  ;;  %61 = vrot.lane.b32.xlu1 %v110_v10, %s140_s8 }
  0x16   :  { %67 = vrot.lane.b32.xlu0 %v111_v11, %s141_s13  ;;  %73 = vrot.lane.b32.xlu1 %v112_v12, %s142_s14 }
  0x1a   :  { %79 = vrot.lane.b32.xlu0 %v113_v13, %s143_s19  ;;  %85 = vrot.lane.b32.xlu1 %v114_v14, %s144_s20 }
  0x1e   :  { %91 = vrot.lane.b32.xlu0 %v115_v15, %s145_s0 }
  0x74   :  { %v8_v16 = vpop.permute.xlu0 %7   ;;  %v20_v17 = vpop.permute.xlu1 %19  }
  0x75   :  { %10 = vst.msk [vmem:[#allocation0] sm:$0x1] %vm9_vm1, %v8_v16  }
  0x78   :  { %v14_v18 = vpop.permute.xlu0 %13   ;;  %v26_v19 = vpop.permute.xlu1 %25  }
  0x79   :  { %16 = vst.msk [vmem:[#allocation0] sm:$0x1] %vm15_vm2, %v14_v18  }
  0x7a   :  { %22 = vst.msk [vmem:[#allocation0] sm:$0x1] %vm21_vm3, %v20_v17  }
  0x7b   :  { %28 = vst.msk [vmem:[#allocation0] sm:$0x1] %vm27_vm4, %v26_v19  }
  0x7c   :  { %v32_v20 = vpop.permute.xlu0 %31   ;;  %v38_v21 = vpop.permute.xlu1 %37  }
  0x7d   :  { %34 = vst.msk [vmem:[#allocation0] sm:$0x1] %vm33_vm5, %v32_v20  }
  0x7e   :  { %40 = vst.msk [vmem:[#allocation0] sm:$0x1] %vm39_vm6, %v38_v21  }
  0x80   :  { %v44_v22 = vpop.permute.xlu0 %43   ;;  %v50_v23 = vpop.permute.xlu1 %49  }
  0x81   :  { %46 = vst.msk [vmem:[#allocation0] sm:$0x1] %vm45_vm7, %v44_v22  }
  0x82   :  { %52 = vst.msk [vmem:[#allocation0] sm:$0x1] %vm51_vm8, %v50_v23  }
  0x84   :  { %v56_v24 = vpop.permute.xlu0 %55   ;;  %v62_v25 = vpop.permute.xlu1 %61  }
  0x85   :  { %58 = vst.msk [vmem:[#allocation0] sm:$0x1] %vm57_vm9, %v56_v24  }
  0x86   :  { %64 = vst.msk [vmem:[#allocation0] sm:$0x1] %vm63_vm10, %v62_v25  }
  0x88   :  { %v68_v26 = vpop.permute.xlu0 %67   ;;  %v74_v27 = vpop.permute.xlu1 %73  }
  0x89   :  { %70 = vst.msk [vmem:[#allocation0] sm:$0x1] %vm69_vm11, %v68_v26  }
  0x8a   :  { %76 = vst.msk [vmem:[#allocation0] sm:$0x1] %vm75_vm12, %v74_v27  }
  0x8c   :  { %v80_v28 = vpop.permute.xlu0 %79   ;;  %v86_v29 = vpop.permute.xlu1 %85  }
  0x8d   :  { %82 = vst.msk [vmem:[#allocation0] sm:$0x1] %vm81_vm13, %v80_v28  }
  0x8e   :  { %88 = vst.msk [vmem:[#allocation0] sm:$0x1] %vm87_vm14, %v86_v29  }
  0x90   :  { %v92_v30 = vpop.permute.xlu0 %91  }
  0x91   :  { %94 = vst.msk [vmem:[#allocation0] sm:$0x1] %vm93_vm15, %v92_v30  }
  0x98   :  { %v98_v31 = vld [vmem:[#allocation0] sm:$0x1] }
  0x99   :  { %100 = vst [vmem:[%s208_s1] sm:$0x1] %v98_v31 }

// kernel: hetconv_pallas.1
= control target key start
LH: loop header
LB: loop body
LE: loop exit
PB: predicated region body
PF: predicated region fallthrough
CT: control target
= control target key end

     0   :  { %s991_s18 = smov 0   ;;  %s993_s19 = smov 0   ;;  %s1284_s0 = inlined_call_operand.vmem [shape: f32[2,16,128], index: 0, kind: input, shape index: {}, may-alias: {0,1,2}]   ;;  %s1285_s1 = inlined_call_operand.vmem [shape: f32[2,16,128], index: 1, kind: input, shape index: {}, may-alias: {0,1,2}]   ;;  %s1286_s2 = inlined_call_operand.vmem [shape: f32[2,16,128], index: 2, kind: input, shape index: {}, may-alias: {0,1,2}]   ;;  %s1287_s3 = inlined_call_operand.vmem [shape: f32[384,128], index: 3, kind: input, shape index: {}]   ;;  %s1288_s4 = inlined_call_operand.vmem [shape: f32[1,128], index: 4, kind: input, shape index: {}]   ;;  %s1289_s5 = inlined_call_operand.vmem [shape: f32[2,16,128], index: 5, kind: output, shape index: {}]  }
   0x1   :  { %s995_s20 = smov 0   ;;  %s997_s21 = smov 0  }
   0x2   :  { %s999_s22 = smov 0  }
   0x3 LB: > { %s24_s23 = sadd.s32 1, %s948_s20  ;;  %s27_s24 = sadd.s32 1, %s952_s21  ;;  %s956_s22 = sphi %s999_s22, %s15_s22   ;;  %s952_s21 = sphi %s997_s21, %s1298_s21   ;;  %s948_s20 = sphi %s995_s20, %s1297_s20   ;;  %s944_s19 = sphi %s993_s19, %s1296_s19   ;;  %s940_s18 = sphi %s991_s18, %s1295_s18  }
   0x4   : > { %p25_p0 = scmp.ge.s32.totalorder %s24_s23, 2  ;;  %p709_p1 = scmp.ge.s32.totalorder %s956_s22, 1 }
   0x5   : > { %p260_p2 = scmp.lt.s32.totalorder %s956_s22, 5 }
   0x6   : > { %s1300_s23 = smov (%p25_p0, %s24_s23), 0  ;;  %s1302_s24 = smov (!%p25_p0, %s27_s24), %s952_s21 }
   0x7   : > { %p261_p3 = pnand %p709_p1, %p260_p2  ;;  %p29_p4 = scmp.ge.s32.totalorder %s1302_s24, 2 }
   0x8   : > { %v401_v0 = vld [vmem:[%s1287_s3 + $0x80] sm:$0xff] (!%p261_p3)  ;;  %v402_v1 = vld [vmem:[%s1287_s3 + $0x88] sm:$0xff] (!%p261_p3)  ;;  %p316_p5 = scmp.lt.s32.totalorder (!%p261_p3), %s944_s19, 1  ;;  %p318_p6 = scmp.lt.s32.totalorder (!%p261_p3), %s940_s18, 1  ;;  %v403_v5 = vld [vmem:[%s1287_s3 + $0x90] sm:$0xff] (!%p261_p3)  ;;  %v958_v7 = vmov (!%p261_p3), 0.0|0.0  }
   0x9   : > { %s1304_s24 = smov (%p29_p4, %s1302_s24), 0  ;;  %264 = sbr.rel (%p261_p3) target bundleno = 264 (0x108), region = 40 }
   0xa   : > { %v385_v2 = vld [vmem:[%s1287_s3] sm:$0xff] (!%p261_p3)  ;;  %v819_v3 = vpack.c.bf16 (!%p261_p3), %v402_v1, %v401_v0  ;;  %v386_v4 = vld [vmem:[%s1287_s3 + $0x8] sm:$0xff] (!%p261_p3)  ;;  %v404_v6 = vld [vmem:[%s1287_s3 + $0x98] sm:$0xff] (!%p261_p3)  ;;  %851 = vmatprep.subr.bf16.mxu1 (!%p261_p3), %v958_v7  ;;  %s338_s12 = sadd.s32 (!%p261_p3), 1, %s940_s18  ;;  %s1048_s13 = sadd.s32 (!%p261_p3), 4294967295, %s940_s18  ;;  %vm959_vm0 = vmmov (!%p261_p3), 0  }
   0xb   : > { %v821_v8 = vpack.c.bf16 (!%p261_p3), %v386_v4, %v385_v2  ;;  %v823_v9 = vpack.c.bf16 (!%p261_p3), %v404_v6, %v403_v5  ;;  %v387_v10 = vld [vmem:[%s1287_s3 + $0x10] sm:$0xff] (!%p261_p3)  ;;  %v388_v11 = vld [vmem:[%s1287_s3 + $0x18] sm:$0xff] (!%p261_p3)  ;;  %v417_v12 = vld [vmem:[%s1287_s3 + $0x100] sm:$0xff] (!%p261_p3)  ;;  %v960_v16 = vmov (!%p261_p3), 0.0   ;;  %p1081_p7 = scmp.lt.s32.totalorder (!%p261_p3), %s338_s12, 1  ;;  %p325_p8 = scmp.gt.s32.totalorder (!%p261_p3), %s1048_s13, 0 }
   0xc   : > { %820 = vmatprep.subr.bf16.mxu0 (!%p261_p3), %v819_v3  ;;  %v418_v13 = vld [vmem:[%s1287_s3 + $0x108] sm:$0xff] (!%p261_p3)  ;;  %v405_v14 = vld [vmem:[%s1287_s3 + $0xa0] sm:$0xff] (!%p261_p3)  ;;  %816 = vmatprep.mubr.msk.f32.mxu1 (!%p261_p3), %vm959_vm0, %v960_v16  ;;  %v825_v17 = vpack.c.bf16 (!%p261_p3), %v388_v11, %v387_v10  ;;  %v419_v19 = vld [vmem:[%s1287_s3 + $0x110] sm:$0xff] (!%p261_p3)  ;;  %p713_p9 = scmp.lt.s32.totalorder (!%p261_p3), %s1048_s13, 1  ;;  %p363_p10 = scmp.gt.s32.totalorder (!%p261_p3), %s940_s18, 0  ;;  %vm376_vm3 = vcmask (!%p261_p3), 1040384  }
   0xd   : > { %v406_v15 = vld [vmem:[%s1287_s3 + $0xa8] sm:$0xff] (!%p261_p3)  ;;  %822 = vmatpush3.bf16.msra.mxu0 (!%p261_p3), %v821_v8  ;;  %v852_v18 = vpack.c.bf16 (!%p261_p3), %v418_v13, %v417_v12  ;;  %v389_v21 = vld [vmem:[%s1287_s3 + $0x20] sm:$0xff] (!%p261_p3)  ;;  %v420_v23 = vld [vmem:[%s1287_s3 + $0x118] sm:$0xff] (!%p261_p3)  ;;  %vm383_vm4 = vcmask (!%p261_p3), 1046528  }
   0xe   : > { %824 = vmatprep.subr.bf16.mxu0 (!%p261_p3), %v823_v9  ;;  %v827_v20 = vpack.c.bf16 (!%p261_p3), %v406_v15, %v405_v14  ;;  %v390_v22 = vld [vmem:[%s1287_s3 + $0x28] sm:$0xff] (!%p261_p3)  ;;  %v855_v24 = vpack.c.bf16 (!%p261_p3), %v420_v23, %v419_v19  ;;  %v407_v25 = vld [vmem:[%s1287_s3 + $0xb0] sm:$0xff] (!%p261_p3)  ;;  %v408_v26 = vld [vmem:[%s1287_s3 + $0xb8] sm:$0xff] (!%p261_p3) }
   0xf   : > { %853 = vmatpush3.bf16.msra.mxu1 (!%p261_p3), %v852_v18  ;;  %v421_v27 = vld [vmem:[%s1287_s3 + $0x120] sm:$0xff] (!%p261_p3)  ;;  %v422_v28 = vld [vmem:[%s1287_s3 + $0x128] sm:$0xff] (!%p261_p3)  ;;  %v829_v29 = vpack.c.bf16 (!%p261_p3), %v390_v22, %v389_v21  ;;  %v831_v30 = vpack.c.bf16 (!%p261_p3), %v408_v26, %v407_v25  ;;  %v391_v31 = vld [vmem:[%s1287_s3 + $0x30] sm:$0xff] (!%p261_p3) }
  0x10   : > { %s1306_s19 = smov (!%p316_p5, %s944_s19), 1  ;;  %854 = vmatprep.subr.bf16.mxu1 %v958_v7  ;;  %s1308_s12 = smov (!%p1081_p7, %s338_s12), 1  ;;  %v392_v32 = vld [vmem:[%s1287_s3 + $0x38] sm:$0xff]  ;;  %v858_v33 = vpack.c.bf16 %v422_v28, %v421_v27  ;;  %v409_v34 = vld [vmem:[%s1287_s3 + $0xc0] sm:$0xff]  ;;  %v410_v35 = vld [vmem:[%s1287_s3 + $0xc8] sm:$0xff] }
  0x11   : > { %s319_s8 = scalar_select %p318_p6, %s940_s18, 1  ;;  %826 = vmatpush3.bf16.msra.mxu0 %v825_v17  ;;  %v423_v36 = vld [vmem:[%s1287_s3 + $0x130] sm:$0xff]  ;;  %v424_v37 = vld [vmem:[%s1287_s3 + $0x138] sm:$0xff]  ;;  %v833_v38 = vpack.c.bf16 %v392_v32, %v391_v31  ;;  %v835_v39 = vpack.c.bf16 %v410_v35, %v409_v34  ;;  %v393_v40 = vld [vmem:[%s1287_s3 + $0x40] sm:$0xff] }
  0x12   : > { %s1077_s11 = sshll.u32 %s1306_s19, 1  ;;  %828 = vmatprep.subr.bf16.mxu0 %v827_v20  ;;  %s1310_s12 = smov (!%p1081_p7, %s1308_s12), 1  ;;  %v394_v41 = vld [vmem:[%s1287_s3 + $0x48] sm:$0xff]  ;;  %v861_v42 = vpack.c.bf16 %v424_v37, %v423_v36  ;;  %v411_v43 = vld [vmem:[%s1287_s3 + $0xd0] sm:$0xff]  ;;  %v412_v44 = vld [vmem:[%s1287_s3 + $0xd8] sm:$0xff] }
  0x13   : > { %s321_s27 = sadd.s32 %s1077_s11, %s319_s8  ;;  %856 = vmatpush3.bf16.msra.mxu1 %v855_v24  ;;  %v425_v45 = vld [vmem:[%s1287_s3 + $0x140] sm:$0xff]  ;;  %v426_v46 = vld [vmem:[%s1287_s3 + $0x148] sm:$0xff]  ;;  %s1171_s16 = sadd.s32 %s1077_s11, %s1310_s12  ;;  %v837_v48 = vpack.c.bf16 %v394_v41, %v393_v40  ;;  %v839_v49 = vpack.c.bf16 %v412_v44, %v411_v43  ;;  %v395_v50 = vld [vmem:[%s1287_s3 + $0x50] sm:$0xff] }
  0x14   : > { %s1109_s15 = sshll.u32 %s321_s27, 3  ;;  %857 = vmatprep.subr.bf16.mxu1 %v958_v7  ;;  %v396_v51 = vld [vmem:[%s1287_s3 + $0x58] sm:$0xff]  ;;  %v864_v52 = vpack.c.bf16 %v426_v46, %v425_v45  ;;  %v413_v53 = vld [vmem:[%s1287_s3 + $0xe0] sm:$0xff]  ;;  %v414_v54 = vld [vmem:[%s1287_s3 + $0xe8] sm:$0xff]  ;;  %s724_s29 = sshll.u32 %s1171_s16, 3 }
  0x15   : > { %s326_s26 = scalar_select %p325_p8, %s1048_s13, 0  ;;  %830 = vmatpush3.bf16.msra.mxu0 %v829_v29  ;;  %v427_v55 = vld [vmem:[%s1287_s3 + $0x150] sm:$0xff]  ;;  %v428_v56 = vld [vmem:[%s1287_s3 + $0x158] sm:$0xff]  ;;  %v841_v57 = vpack.c.bf16 %v396_v51, %v395_v50  ;;  %v843_v58 = vpack.c.bf16 %v414_v54, %v413_v53  ;;  %v397_v59 = vld [vmem:[%s1287_s3 + $0x60] sm:$0xff] }
  0x16   : > { %s323_s9 = scalar_lea.vmem %s1284_s0, %s1109_s15  ;;  %832 = vmatprep.subr.bf16.mxu0 %v831_v30  ;;  %v398_v60 = vld [vmem:[%s1287_s3 + $0x68] sm:$0xff]  ;;  %s348_s18 = scalar_lea.vmem %s1286_s2, %s724_s29  ;;  %v867_v62 = vpack.c.bf16 %v428_v56, %v427_v55  ;;  %v415_v63 = vld [vmem:[%s1287_s3 + $0xf0] sm:$0xff]  ;;  %v416_v0 = vld [vmem:[%s1287_s3 + $0xf8] sm:$0xff] }
  0x17   : > { %s1312_s26 = smov (!%p713_p9, %s326_s26), 1  ;;  %859 = vmatpush3.bf16.msra.mxu1 %v858_v33  ;;  %v1173_v47 = vld [vmem:[%s323_s9] sm:$0xff]  ;;  %v430_v2 = vld [vmem:[%s1287_s3 + $0x168] sm:$0xff]  ;;  %v845_v4 = vpack.c.bf16 %v398_v60, %v397_v59  ;;  %v847_v8 = vpack.c.bf16 %v416_v0, %v415_v63  ;;  %v399_v9 = vld [vmem:[%s1287_s3 + $0x70] sm:$0xff]  ;;  %s359_s13 = scalar_lea.vmem %s1289_s5, %s1109_s15 }
  0x18   : > { %860 = vmatprep.subr.bf16.mxu1 %v958_v7  ;;  %504 = vmatprep.mubr.f32.mxu0 %v1173_v47  ;;  %s332_s17 = sadd.s32 %s1312_s26, %s1077_s11  ;;  %v429_v1 = vld [vmem:[%s1287_s3 + $0x160] sm:$0xff]  ;;  %v400_v10 = vld [vmem:[%s1287_s3 + $0x78] sm:$0xff]  ;;  %v431_v14 = vld [vmem:[%s1287_s3 + $0x170] sm:$0xff]  ;;  %v374_v18 = vrot.slane %v1173_v47, 7  ;;  %v378_v20 = vrot.slane %v1173_v47, 1 }
  0x19   : > { %834 = vmatpush3.bf16.msra.mxu0 %v833_v38  ;;  %s1187_s12 = scalar_select %p318_p6, 1, 0  ;;  %v362_v5 = vld [vmem:[%s348_s18] sm:$0x1]  ;;  %v870_v11 = vpack.c.bf16 %v430_v2, %v429_v1  ;;  %v432_v15 = vld [vmem:[%s1287_s3 + $0x178] sm:$0xff]  ;;  %v849_v17 = vpack.c.bf16 %v400_v10, %v399_v9 }
  0x1a   : > { %836 = vmatprep.subr.bf16.mxu0 %v835_v39  ;;  %s1205_s8 = scalar_select %p363_p10, 1, 0  ;;  %v873_v21 = vpack.c.bf16 %v432_v15, %v431_v14  ;;  %v727_v27 = vld [vmem:[%s1288_s4] ss:$0 sm:$0xff] }
  0x1b   : > { %862 = vmatpush3.bf16.msra.mxu1 %v861_v42  ;;  %s719_s10 = sshll.u32 %s332_s17, 3  ;;  %v370_v61 = vstv %s1187_s12 }
  0x1c   : > { %863 = vmatprep.subr.bf16.mxu1 %v958_v7  ;;  %s334_s16 = scalar_lea.vmem %s1285_s1, %s719_s10  ;;  %v365_v3 = vstv %s1205_s8  ;;  %vm1234_vm1 = vcmp.eq.s32.totalorder %v370_v61, 1 }
  0x1d   : > { %838 = vmatpush3.bf16.msra.mxu0 %v837_v48  ;;  %v361_v12 = vld [vmem:[%s334_s16 + $0x7] sm:$0x1]  ;;  %vm1244_vm2 = vcmp.eq.s32.totalorder %v365_v3, 1  ;;  %v372_v16 = vsel %vm1234_vm1, %v362_v5, 0.0 }
  0x1e   : > { %840 = vmatprep.subr.bf16.mxu0 %v839_v49  ;;  %v367_v19 = vsel %vm1244_vm2, %v361_v12, 0.0  ;;  %v381_v22 = vrot.slane %v372_v16, 1 }
  0x1f   : > { %865 = vmatpush3.bf16.msra.mxu1 %v864_v52  ;;  %v377_v23 = vsel %vm376_vm3, %v367_v19, %v374_v18 }
  0x20   : > { %866 = vmatprep.subr.bf16.mxu1 %v958_v7  ;;  %v384_v24 = vsel %vm383_vm4, %v378_v20, %v381_v22 }
  0x21   : > { %842 = vmatpush3.bf16.msra.mxu0 %v841_v57 }
  0x22   : > { %844 = vmatprep.subr.bf16.mxu0 %v843_v58 }
  0x23   : > { %868 = vmatpush3.bf16.msra.mxu1 %v867_v62 }
  0x24   : > { %869 = vmatprep.subr.bf16.mxu1 %v958_v7 }
  0x25   : > { %846 = vmatpush3.bf16.msra.mxu0 %v845_v4 }
  0x26   : > { %848 = vmatprep.subr.bf16.mxu0 %v847_v8 }
  0x27   : > { %871 = vmatpush3.bf16.msra.mxu1 %v870_v11 }
  0x28   : > { %872 = vmatprep.subr.bf16.mxu1 %v958_v7 }
  0x29   : > { %850 = vmatpush3.bf16.msra.mxu0 %v849_v17 }
  0x2b   : > { %874 = vmatpush3.bf16.msra.mxu1 %v873_v21 }
  0x2c   : > { %505 = vmatmul.mubr.f32.vlgmr.msra.gmra.mrb[0].mxu0 %v377_v23 }
  0x2e   : > { %817 = vmatmul.mubr.f32.vlgmr.msra.gmra.mrb[0].mxu1 %v384_v24 }
  0xff   : > { %v764_v25 = vpop.f32.mrb[0].mxu0 }
 0x100   : > { %v765_v26 = vpop.f32.mrb[1].mxu0 }
 0x101   : > { %v766_v28 = vadd.f32 %v765_v26, %v764_v25  ;;  %v576_v29 = vpop.f32.mrb[0].mxu1 }
 0x102   : > { %v818_v30 = vpop.f32.mrb[1].mxu1 }
 0x103   : > { %v507_v31 = vadd.f32 %v766_v28, %v727_v27 }
 0x105   : > { %v577_v7 = vadd.f32 %v576_v29, %v507_v31 }
 0x107   : > { %580 = vst [vmem:[%s359_s13] sm:$0xff] %v577_v7 }
 0x108 PF: > { %s15_s22 = sadd.s32 1, %s956_s22   ;;  %s1295_s18 = smov %s948_s20 }
 0x109   : > { %p12_p11 = scmp.ge.s32.totalorder %s15_s22, 6   ;;  %s1296_s19 = smov %s952_s21 }
 0x10a   : > { %s1297_s20 = smov %s1300_s23  ;;  %s1298_s21 = smov %s1304_s24 }
 0x10b   :  { %14 = sbr.rel (!%p12_p11) target bundleno = 3 (0x3), region = 76 }

</bundles_post_ra>
